<compile_context>
chip_gen: v5e
topology: v5e:2x2
jax: 0.10.0
libtpu: 0.0.40
codegen_flags: <defaults>
</compile_context>

<pallas_src>
import functools
import math

import jax
import jax.numpy as jnp
from jax.experimental import pallas as pl
from jax.experimental.pallas import tpu as pltpu


def _pick_tile(n, candidates=(512, 256, 128, 64, 32, 16, 8)):
    for c in candidates:
        if n % c == 0:
            return c
    return n


# ----------------------------------------------------------------------------
# Kernel 1: fused residual-add + LayerNorm + in_proj matmul
# ----------------------------------------------------------------------------
def _add_ln_inproj_kernel(h_ref, r_ref, g_ref, b_ref, win_ref, xz_ref, res_ref, *, eps):
    res = h_ref[...] + r_ref[...]                       # (tm, D) f32
    res_ref[...] = res                                  # residual out (fp32)
    mean = jnp.mean(res, axis=-1, keepdims=True)
    cen = res - mean
    var = jnp.mean(cen * cen, axis=-1, keepdims=True)
    normed = cen * jax.lax.rsqrt(var + eps) * g_ref[...] + b_ref[...]
    xz_ref[...] = jnp.dot(normed.astype(jnp.bfloat16), win_ref[...],
                          preferred_element_type=jnp.float32)


def add_ln_inproj(hidden2d, residual2d, ln_w, ln_b, w_in_bf16, eps=1e-5):
    M, D = hidden2d.shape
    two_e = w_in_bf16.shape[1]
    tm = _pick_tile(M)
    xz, res = pl.pallas_call(
        functools.partial(_add_ln_inproj_kernel, eps=eps),
        out_shape=(
            jax.ShapeDtypeStruct((M, two_e), jnp.float32),
            jax.ShapeDtypeStruct((M, D), jnp.float32),
        ),
        grid_spec=pltpu.PrefetchScalarGridSpec(
            num_scalar_prefetch=0,
            grid=(M // tm,),
            in_specs=[
                pl.BlockSpec((tm, D), lambda i: (i, 0)),
                pl.BlockSpec((tm, D), lambda i: (i, 0)),
                pl.BlockSpec((1, D), lambda i: (0, 0)),
                pl.BlockSpec((1, D), lambda i: (0, 0)),
                pl.BlockSpec((D, two_e), lambda i: (0, 0)),   # weight stays resident
            ],
            out_specs=[
                pl.BlockSpec((tm, two_e), lambda i: (i, 0)),
                pl.BlockSpec((tm, D), lambda i: (i, 0)),
            ],
        ),
        compiler_params=pltpu.CompilerParams(
            dimension_semantics=("parallel",),
            vmem_limit_bytes=32 * 1024 * 1024),
    )(hidden2d, residual2d, ln_w.reshape(1, D), ln_b.reshape(1, D), w_in_bf16)
    return xz, res


# ----------------------------------------------------------------------------
# Kernel 3: fused (y_fwd + y_bwd) add + out_proj matmul
# ----------------------------------------------------------------------------
def _add_outproj_kernel(yf_ref, yb_ref, wout_ref, o_ref):
    y = (yf_ref[...] + yb_ref[...]).astype(jnp.bfloat16)
    o_ref[...] = jnp.dot(y, wout_ref[...], preferred_element_type=jnp.float32)


def add_outproj(y_f, y_b, w_out_bf16):
    M, E = y_f.shape
    D = w_out_bf16.shape[1]
    tm = _pick_tile(M)
    return pl.pallas_call(
        _add_outproj_kernel,
        out_shape=jax.ShapeDtypeStruct((M, D), jnp.float32),
        grid_spec=pltpu.PrefetchScalarGridSpec(
            num_scalar_prefetch=0,
            grid=(M // tm,),
            in_specs=[
                pl.BlockSpec((tm, E), lambda i: (i, 0)),
                pl.BlockSpec((tm, E), lambda i: (i, 0)),
                pl.BlockSpec((E, D), lambda i: (0, 0)),
            ],
            out_specs=pl.BlockSpec((tm, D), lambda i: (i, 0)),
        ),
        compiler_params=pltpu.CompilerParams(
            dimension_semantics=("parallel",),
            vmem_limit_bytes=32 * 1024 * 1024),
    )(y_f, y_b, w_out_bf16)


# ----------------------------------------------------------------------------
# Kernel 2: fused bidirectional Mamba inner kernel, chunked over the sequence.
#   grid = (batch, L // T_c).  Per grid step it processes the forward direction
#   on chunk j and the backward direction on chunk (n_chunks-1-j); SSM state and
#   conv tails live in scratch and carry across the "arbitrary" chunk axis.
# ----------------------------------------------------------------------------
def _bimamba_scan_kernel(
        xzf_ref, xzb_ref, convw_ref, convb_ref, wx_ref, wdt_ref, dtb_ref,
        at_ref, dv_ref,                                    # inputs
        yf_ref, yb_ref,                                    # outputs
        xpad_f, xpad_b, dA_f, dA_b, bcol_f, bcol_b, ccol_f, ccol_b,
        dtx_f, dtx_b, hf_ref, hb_ref,                      # scratch
        *, E, N, R, K, T_c):
    j = pl.program_id(1)

    @pl.when(j == 0)
    def _():
        hf_ref[...] = jnp.zeros_like(hf_ref)
        hb_ref[...] = jnp.zeros_like(hb_ref)

    def prep(xz, d, forward, xpad_ref, dA_ref, bcol_ref, ccol_ref, dtx_ref):
        x = xz[:, :E]
        z = xz[:, E:]
        conv_w = convw_ref[d]                              # (K, E)

        if forward:
            # causal depthwise conv; carry = last K-1 rows of previous chunk
            @pl.when(j == 0)
            def _():
                xpad_ref[0:K - 1, :] = jnp.zeros((K - 1, E), jnp.float32)

            @pl.when(j > 0)
            def _():
                xpad_ref[0:K - 1, :] = xpad_ref[T_c:T_c + K - 1, :]

            xpad_ref[K - 1:K - 1 + T_c, :] = x
        else:
            # backward direction processed in original time order -> anti-causal
            # conv; carry = first K-1 rows of the previously processed (next in
            # time) chunk
            @pl.when(j == 0)
            def _():
                xpad_ref[T_c:T_c + K - 1, :] = jnp.zeros((K - 1, E), jnp.float32)

            @pl.when(j > 0)
            def _():
                xpad_ref[T_c:T_c + K - 1, :] = xpad_ref[0:K - 1, :]

            xpad_ref[0:T_c, :] = x

        xp = xpad_ref[...]                                  # (T_c+K-1, E)
        acc = jnp.broadcast_to(convb_ref[d], (T_c, E))
        for k in range(K):                                  # static taps, no concat
            tap = conv_w[k:k + 1, :] if forward else conv_w[K - 1 - k:K - k, :]
            acc = acc + xp[k:k + T_c, :] * tap
        xc = acc * jax.nn.sigmoid(acc)                      # SiLU

        # x_proj (lane-padded output width) -> (dt_raw, B, C)
        xdbl = jnp.dot(xc.astype(jnp.bfloat16), wx_ref[d],
                       preferred_element_type=jnp.float32)  # (T_c, P)
        dt_raw = xdbl[:, :R]
        Bm = xdbl[:, R:R + N]
        Cm = xdbl[:, R + N:R + 2 * N]

        dt = jnp.dot(dt_raw, wdt_ref[d],
                     preferred_element_type=jnp.float32) + dtb_ref[d]
        dt = jnp.where(dt > 20.0, dt,
                       jnp.log1p(jnp.exp(jnp.minimum(dt, 20.0))))   # softplus

        # exp(dt*A) precomputed for the whole chunk: EUP slot overlaps the MXU/VPU
        # prologue and the transcendental stays off the serial recurrence chain.
        # NOTE: for the S4D-real init (A = -1..-N broadcast over E) this could be
        # replaced by N cumulative multiplies of exp(-dt) to cut EUP work 16x.
        dA_ref[...] = jnp.exp(dt[:, None, :] * at_ref[d][None, :, :])   # (T_c,N,E)
        # per-step B/C columns in (N, 1) sublane layout — no 128-lane broadcast
        # materialization (the lane broadcast happens for free inside the loop mul).
        bcol_ref[...] = Bm[:, :, None]                       # (T_c, N, 1)
        ccol_ref[...] = Cm[:, :, None]                       # (T_c, N, 1)
        dtx_ref[...] = dt * xc
        return z * jax.nn.sigmoid(z), dv_ref[d] * xc        # gate, D-skip

    gate_f, skip_f = prep(xzf_ref[...], 0, True, xpad_f, dA_f, bcol_f, ccol_f, dtx_f)
    gate_b, skip_b = prep(xzb_ref[...], 1, False, xpad_b, dA_b, bcol_b, ccol_b, dtx_b)

    # Sequential recurrence: both directions interleaved; all VPU/XLU, no MXU.
    # The B*(dt*x) outer product and the C-contraction are off the h->h carried
    # dependency and hide under its latency.
    def one_step(s):
        # forward, time t = s
        h = dA_f[s] * hf_ref[...] + bcol_f[s] * dtx_f[pl.ds(s, 1), :]
        hf_ref[...] = h
        yf_ref[pl.ds(s, 1), :] = jnp.sum(ccol_f[s] * h, axis=0, keepdims=True)
        # backward, time t = T_c - 1 - s (descending)
        t = T_c - 1 - s
        g = dA_b[t] * hb_ref[...] + bcol_b[t] * dtx_b[pl.ds(t, 1), :]
        hb_ref[...] = g
        yb_ref[pl.ds(t, 1), :] = jnp.sum(ccol_b[t] * g, axis=0, keepdims=True)

    if T_c <= 32:
        # Small chunk: fully static unroll (all indices static, full LLO visibility).
        for s in range(T_c):
            one_step(s)
    elif T_c % 2 == 0:
        # 2 timesteps per scf.for iteration: halves loop overhead, 2 independent
        # fwd/bwd chains per body for ILP.
        @pl.loop(0, T_c, step=2)
        def _(s):
            one_step(s)
            one_step(s + 1)
    else:
        @pl.loop(0, T_c)
        def _(s):
            one_step(s)

    # D-skip and SiLU(z) gating (epilogue, lane-dense whole-block stores)
    yf_ref[...] = (yf_ref[...] + skip_f) * gate_f
    yb_ref[...] = (yb_ref[...] + skip_b) * gate_b


def bimamba_scan(xz, conv_w, conv_b, wx_T, wdt_T, dt_bias, AT, Dv, d_state, dt_rank):
    B, L, two_e = xz.shape
    E = two_e // 2
    N, R, K = d_state, dt_rank, conv_w.shape[1]
    P = wx_T.shape[-1]
    # Chunk length: 128 max keeps the (T_c, N, E) dA scratch inside the scoped
    # VMEM budget even for large d_inner (v7x has only 64 MiB VMEM per core).
    T_c = _pick_tile(L, (128, 64, 32, 16, 8))
    n_chunks = L // T_c
    wx_bf16 = wx_T.astype(jnp.bfloat16)

    kernel = functools.partial(_bimamba_scan_kernel, E=E, N=N, R=R, K=K, T_c=T_c)
    y_f, y_b = pl.pallas_call(
        kernel,
        out_shape=(
            jax.ShapeDtypeStruct((B, L, E), jnp.float32),
            jax.ShapeDtypeStruct((B, L, E), jnp.float32),
        ),
        grid_spec=pltpu.PrefetchScalarGridSpec(
            num_scalar_prefetch=0,
            grid=(B, n_chunks),
            in_specs=[
                pl.BlockSpec((None, T_c, two_e), lambda b, j: (b, j, 0)),
                pl.BlockSpec((None, T_c, two_e),
                             lambda b, j: (b, n_chunks - 1 - j, 0)),
                pl.BlockSpec((2, K, E), lambda b, j: (0, 0, 0)),
                pl.BlockSpec((2, 1, E), lambda b, j: (0, 0, 0)),
                pl.BlockSpec((2, E, P), lambda b, j: (0, 0, 0)),
                pl.BlockSpec((2, R, E), lambda b, j: (0, 0, 0)),
                pl.BlockSpec((2, 1, E), lambda b, j: (0, 0, 0)),
                pl.BlockSpec((2, N, E), lambda b, j: (0, 0, 0)),
                pl.BlockSpec((2, 1, E), lambda b, j: (0, 0, 0)),
            ],
            out_specs=[
                pl.BlockSpec((None, T_c, E), lambda b, j: (b, j, 0)),
                pl.BlockSpec((None, T_c, E),
                             lambda b, j: (b, n_chunks - 1 - j, 0)),
            ],
            scratch_shapes=[
                pltpu.VMEM((T_c + K - 1, E), jnp.float32),   # xpad fwd (conv carry)
                pltpu.VMEM((T_c + K - 1, E), jnp.float32),   # xpad bwd
                pltpu.VMEM((T_c, N, E), jnp.float32),        # dA fwd (chunk only)
                pltpu.VMEM((T_c, N, E), jnp.float32),        # dA bwd
                pltpu.VMEM((T_c, N, 1), jnp.float32),        # B columns fwd
                pltpu.VMEM((T_c, N, 1), jnp.float32),        # B columns bwd
                pltpu.VMEM((T_c, N, 1), jnp.float32),        # C columns fwd
                pltpu.VMEM((T_c, N, 1), jnp.float32),        # C columns bwd
                pltpu.VMEM((T_c, E), jnp.float32),           # dt*xc fwd
                pltpu.VMEM((T_c, E), jnp.float32),           # dt*xc bwd
                pltpu.VMEM((N, E), jnp.float32),             # SSM state fwd
                pltpu.VMEM((N, E), jnp.float32),             # SSM state bwd
            ],
        ),
        compiler_params=pltpu.CompilerParams(
            dimension_semantics=("parallel", "arbitrary"),
            vmem_limit_bytes=48 * 1024 * 1024),
    )(xz, xz, conv_w, conv_b, wx_bf16, wdt_T, dt_bias, AT, Dv)
    return y_f, y_b


# ----------------------------------------------------------------------------
# Parameter init (deterministic, synthetic; fwd/bwd direction params stacked)
# ----------------------------------------------------------------------------
def init_block_params(key, d_model, d_state=16, d_conv=4, expand=2):
    D = d_model
    E = expand * D
    N, K = d_state, d_conv
    R = int(math.ceil(D / 16))
    P = ((R + 2 * N + 127) // 128) * 128                 # lane-padded x_proj width
    keys = jax.random.split(key, 4)

    def nrm(k, shape, scale=0.02):
        return (scale * jax.random.normal(k, shape)).astype(jnp.float32)

    def dir_params(k):
        ks = jax.random.split(k, 4)
        conv_w = nrm(ks[0], (K, E), 0.2)
        conv_b = jnp.zeros((1, E), jnp.float32)
        wx = jnp.zeros((E, P), jnp.float32)
        wx = wx.at[:, :R + 2 * N].set(nrm(ks[1], (E, R + 2 * N)))
        wdt = nrm(ks[2], (R, E), R ** -0.5)
        u = jax.random.uniform(ks[3], (E,))
        dt = jnp.exp(u * (math.log(0.1) - math.log(1e-3)) + math.log(1e-3))
        dt = jnp.clip(dt, 1e-4)
        dt_bias = (dt + jnp.log(-jnp.expm1(-dt))).reshape(1, E).astype(jnp.float32)
        AT = -jnp.broadcast_to(
            jnp.arange(1, N + 1, dtype=jnp.float32)[:, None], (N, E))
        Dv = jnp.ones((1, E), jnp.float32)
        return conv_w, conv_b, wx, wdt, dt_bias, AT, Dv

    fwd = dir_params(keys[2])
    bwd = dir_params(keys[3])
    conv_w, conv_b, wx_T, wdt_T, dt_bias, AT, Dv = [
        jnp.stack([f, b], axis=0) for f, b in zip(fwd, bwd)]

    params = dict(
        norm_w=jnp.ones((D,), jnp.float32),
        norm_b=jnp.zeros((D,), jnp.float32),
        w_in_T=nrm(keys[0], (D, 2 * E)),                 # in_proj
        w_out_T=nrm(keys[1], (E, D)),                    # out_proj
        conv_w=conv_w, conv_b=conv_b, wx_T=wx_T, wdt_T=wdt_T,
        dt_bias=dt_bias, AT=AT, Dv=Dv)
    cfg = dict(d_state=N, dt_rank=R, d_conv=K, expand=expand)
    return params, cfg


# ----------------------------------------------------------------------------
# Block forward
# ----------------------------------------------------------------------------
def block_forward(params, cfg, hidden_states, residual=None, eps=1e-5):
    B, L, D = hidden_states.shape
    E = cfg["expand"] * D
    N, R = cfg["d_state"], cfg["dt_rank"]
    if residual is None:
        residual = jnp.zeros_like(hidden_states)         # == "residual = hidden"
    M = B * L

    w_in_bf16 = params["w_in_T"].astype(jnp.bfloat16)
    w_out_bf16 = params["w_out_T"].astype(jnp.bfloat16)

    # drop_path = 0.0 -> Identity ; residual_in_fp32 -> residual kept f32
    xz2, resid2 = add_ln_inproj(hidden_states.reshape(M, D),
                                residual.reshape(M, D),
                                params["norm_w"], params["norm_b"],
                                w_in_bf16, eps=eps)
    xz = xz2.reshape(B, L, 2 * E)

    y_f, y_b = bimamba_scan(xz, params["conv_w"], params["conv_b"],
                            params["wx_T"], params["wdt_T"], params["dt_bias"],
                            params["AT"], params["Dv"], N, R)

    out = add_outproj(y_f.reshape(M, E), y_b.reshape(M, E),
                      w_out_bf16).reshape(B, L, D)
    return out, resid2.reshape(B, L, D)


if __name__ == "__main__":
    key = jax.random.PRNGKey(0)
    k_par, k_h, k_r = jax.random.split(key, 3)

    B, L, D = 2, 8, 32   # batch=2, seq=8, d_model=32 (d_inner=64, d_state=16)
    params, cfg = init_block_params(k_par, D)
    hidden = jax.random.normal(k_h, (B, L, D), jnp.float32)
    residual = jax.random.normal(k_r, (B, L, D), jnp.float32)

    out, res = block_forward(params, cfg, hidden, residual)
    jax.block_until_ready((out, res))
    assert out.shape == (B, L, D) and res.shape == (B, L, D)
    assert bool(jnp.all(jnp.isfinite(out))) and bool(jnp.all(jnp.isfinite(res)))
    print("KERNEL_OK")
</pallas_src>

<mosaic_0001>
module attributes {stable_mosaic.version = 11 : i64} {
  func.func @_add_ln_inproj_kernel(%arg0: i32, %arg1: memref<16x32xf32, #tpu.memory_space<vmem>>, %arg2: memref<16x32xf32, #tpu.memory_space<vmem>>, %arg3: memref<1x32xf32, #tpu.memory_space<vmem>>, %arg4: memref<1x32xf32, #tpu.memory_space<vmem>>, %arg5: memref<32x128xbf16, #tpu.memory_space<vmem>>, %arg6: memref<16x128xf32, #tpu.memory_space<vmem>>, %arg7: memref<16x32xf32, #tpu.memory_space<vmem>>) attributes {dimension_semantics = [#tpu.dimension_semantics<parallel>], iteration_bounds = array<i64: 1>, scalar_prefetch = 0 : i64, scratch_operands = 0 : i64, tpu.core_type = #tpu.core_type<tc>, window_params = [{transform_indices = @transform_0, window_bounds = array<i64: 16, 32>}, {transform_indices = @transform_1, window_bounds = array<i64: 16, 32>}, {pipeline_mode = #tpu.pipeline_mode<synchronous>, transform_indices = @transform_2, window_bounds = array<i64: 1, 32>}, {pipeline_mode = #tpu.pipeline_mode<synchronous>, transform_indices = @transform_3, window_bounds = array<i64: 1, 32>}, {pipeline_mode = #tpu.pipeline_mode<synchronous>, transform_indices = @transform_4, window_bounds = array<i64: 32, 128>}, {transform_indices = @transform_5, window_bounds = array<i64: 16, 128>}, {transform_indices = @transform_6, window_bounds = array<i64: 16, 32>}]} {
    %c0 = arith.constant 0 : index
    %c0_0 = arith.constant 0 : index
    %0 = vector.load %arg1[%c0, %c0_0] : memref<16x32xf32, #tpu.memory_space<vmem>>, vector<16x32xf32>
    %c0_1 = arith.constant 0 : index
    %c0_2 = arith.constant 0 : index
    %1 = vector.load %arg2[%c0_1, %c0_2] : memref<16x32xf32, #tpu.memory_space<vmem>>, vector<16x32xf32>
    %2 = arith.addf %0, %1 : vector<16x32xf32>
    %c0_3 = arith.constant 0 : index
    %c0_4 = arith.constant 0 : index
    %3 = vector.load %arg7[%c0_3, %c0_4] : memref<16x32xf32, #tpu.memory_space<vmem>>, vector<16x32xf32>
    tpu.vector_store %arg7[%c0_3, %c0_4], %2 {strides = array<i32>} : memref<16x32xf32, #tpu.memory_space<vmem>>, vector<16x32xf32>,
    %cst = arith.constant dense<0.000000e+00> : vector<16xf32>
    %4 = vector.multi_reduction <add>, %2, %cst [1] : vector<16x32xf32> to vector<16xf32>
    %5 = vector.shape_cast %4 : vector<16xf32> to vector<16x1xf32>
    %cst_5 = arith.constant 3.200000e+01 : f32
    %6 = vector.broadcast %cst_5 : f32 to vector<16x1xf32>
    %7 = arith.divf %5, %6 : vector<16x1xf32>
    %8 = vector.broadcast %7 : vector<16x1xf32> to vector<16x32xf32>
    %9 = arith.subf %2, %8 : vector<16x32xf32>
    %10 = arith.mulf %9, %9 : vector<16x32xf32>
    %cst_6 = arith.constant dense<0.000000e+00> : vector<16xf32>
    %11 = vector.multi_reduction <add>, %10, %cst_6 [1] : vector<16x32xf32> to vector<16xf32>
    %12 = vector.shape_cast %11 : vector<16xf32> to vector<16x1xf32>
    %cst_7 = arith.constant 3.200000e+01 : f32
    %13 = vector.broadcast %cst_7 : f32 to vector<16x1xf32>
    %14 = arith.divf %12, %13 : vector<16x1xf32>
    %cst_8 = arith.constant 9.99999974E-6 : f32
    %15 = vector.broadcast %cst_8 : f32 to vector<16x1xf32>
    %16 = arith.addf %14, %15 : vector<16x1xf32>
    %17 = math.rsqrt %16 : vector<16x1xf32>
    %18 = vector.broadcast %17 : vector<16x1xf32> to vector<16x32xf32>
    %19 = arith.mulf %9, %18 : vector<16x32xf32>
    %c0_9 = arith.constant 0 : index
    %c0_10 = arith.constant 0 : index
    %20 = vector.load %arg3[%c0_9, %c0_10] : memref<1x32xf32, #tpu.memory_space<vmem>>, vector<1x32xf32>
    %21 = vector.broadcast %20 : vector<1x32xf32> to vector<16x32xf32>
    %22 = arith.mulf %19, %21 : vector<16x32xf32>
    %c0_11 = arith.constant 0 : index
    %c0_12 = arith.constant 0 : index
    %23 = vector.load %arg4[%c0_11, %c0_12] : memref<1x32xf32, #tpu.memory_space<vmem>>, vector<1x32xf32>
    %24 = vector.broadcast %23 : vector<1x32xf32> to vector<16x32xf32>
    %25 = arith.addf %22, %24 : vector<16x32xf32>
    %26 = arith.truncf %25 : vector<16x32xf32> to vector<16x32xbf16>
    %c0_13 = arith.constant 0 : index
    %c0_14 = arith.constant 0 : index
    %27 = vector.load %arg5[%c0_13, %c0_14] : memref<32x128xbf16, #tpu.memory_space<vmem>>, vector<32x128xbf16>
    %cst_15 = arith.constant dense<0.000000e+00> : vector<16x128xf32>
    %28 = tpu.matmul %26, %27, %cst_15 {dimension_numbers = #tpu.dot_dimension_numbers<[1], [0], [0], [1], [0, 0, 1, 1], [], []>} : vector<16x32xbf16>, vector<32x128xbf16>, vector<16x128xf32> -> vector<16x128xf32>
    %c0_16 = arith.constant 0 : index
    %c0_17 = arith.constant 0 : index
    %29 = vector.load %arg6[%c0_16, %c0_17] : memref<16x128xf32, #tpu.memory_space<vmem>>, vector<16x128xf32>
    tpu.vector_store %arg6[%c0_16, %c0_17], %28 {strides = array<i32>} : memref<16x128xf32, #tpu.memory_space<vmem>>, vector<16x128xf32>,
    return
  }
  func.func @transform_0(%arg0: i32) -> (i32, i32) {
    %c0_i32 = arith.constant 0 : i32
    %c0_i32_0 = arith.constant 0 : i32
    return %arg0, %c0_i32 : i32, i32
  }
  func.func @transform_1(%arg0: i32) -> (i32, i32) {
    %c0_i32 = arith.constant 0 : i32
    %c0_i32_0 = arith.constant 0 : i32
    return %arg0, %c0_i32 : i32, i32
  }
  func.func @transform_2(%arg0: i32) -> (i32, i32) {
    %c0_i32 = arith.constant 0 : i32
    %c0_i32_0 = arith.constant 0 : i32
    %c0_i32_1 = arith.constant 0 : i32
    return %c0_i32, %c0_i32_0 : i32, i32
  }
  func.func @transform_3(%arg0: i32) -> (i32, i32) {
    %c0_i32 = arith.constant 0 : i32
    %c0_i32_0 = arith.constant 0 : i32
    %c0_i32_1 = arith.constant 0 : i32
    return %c0_i32, %c0_i32_0 : i32, i32
  }
  func.func @transform_4(%arg0: i32) -> (i32, i32) {
    %c0_i32 = arith.constant 0 : i32
    %c0_i32_0 = arith.constant 0 : i32
    %c0_i32_1 = arith.constant 0 : i32
    return %c0_i32, %c0_i32_0 : i32, i32
  }
  func.func @transform_5(%arg0: i32) -> (i32, i32) {
    %c0_i32 = arith.constant 0 : i32
    %c0_i32_0 = arith.constant 0 : i32
    return %arg0, %c0_i32 : i32, i32
  }
  func.func @transform_6(%arg0: i32) -> (i32, i32) {
    %c0_i32 = arith.constant 0 : i32
    %c0_i32_0 = arith.constant 0 : i32
    return %arg0, %c0_i32 : i32, i32
  }
}

</mosaic_0001>

<bundles_post_ra>
// kernel: tpu_custom_call.1
= control target key start
LH: loop header
LB: loop body
LE: loop exit
PB: predicated region body
PF: predicated region fallthrough
CT: control target
= control target key end

     0   :  { %12 = vsyncpa [#allocation3], 0  ;;  %s460_s0 = inlined_call_operand.hbm [shape: f32[16,32], index: 0, kind: input, shape index: {}]   ;;  %s461_s1 = inlined_call_operand.hbm [shape: f32[16,32], index: 1, kind: input, shape index: {}]   ;;  %s462_s2 = inlined_call_operand.vmem [shape: f32[1,32], index: 2, kind: input, shape index: {}]   ;;  %s463_s3 = inlined_call_operand.vmem [shape: f32[1,32], index: 3, kind: input, shape index: {}]   ;;  %s464_s4 = inlined_call_operand.hbm [shape: bf16[32,128], index: 4, kind: input, shape index: {}]   ;;  %s465_s5 = inlined_call_operand.hbm [shape: f32[16,128], index: 5, kind: output, shape index: {0}]   ;;  %s466_s6 = inlined_call_operand.hbm [shape: f32[16,32], index: 6, kind: output, shape index: {1}]  }
   0x1   :  { %13 = vsyncpa [#allocation6], 0 }
   0x2   :  { %14 = vsyncpa [#allocation4], 0 }
   0x3   :  { %15 = vsyncpa [#allocation10], 0  ;;  %s33_s23 = sshll.u32 %s461_s1, 4  ;;  %s375_s24 = smov [#allocation5]   ;;  %s34_s23 = int_to_ptr.hbm [resolvable:$true] %s33_s23 }
   0x4   :  { %s35_s25 = sshll.u32 %s375_s24, 4  ;;  %s20_s28 = sshll.u32 %s460_s0, 4  ;;  %s36_s25 = int_to_ptr.vmem [resolvable:$true] %s35_s25  ;;  %s21_s28 = int_to_ptr.hbm [resolvable:$true] %s20_s28 }
   0x5   :  { %s376_s29 = smov 128   ;;  %s377_s30 = smov 8  }
   0x6   :  { %41 = dma.hbm_to_vmem [thread:$0]  %s34_s23, 256, %s36_s25, [#allocation6], %s376_s29, %s376_s29, %s377_s30  }
   0x7   :  { %s378_s7 = smov [#allocation2]   ;;  %s50_s1 = sshll.u32 %s464_s4, 4  ;;  %s51_s1 = int_to_ptr.hbm [resolvable:$true] %s50_s1 }
   0x8   :  { %s22_s8 = sshll.u32 %s378_s7, 4  ;;  %s379_s0 = smov [#allocation7]   ;;  %s23_s8 = int_to_ptr.vmem [resolvable:$true] %s22_s8 }
   0x9   :  { %28 = dma.hbm_to_vmem [thread:$0]  %s21_s28, 256, %s23_s8, [#allocation3], %s376_s29, %s376_s29, %s377_s30  }
   0xa   :  { %s52_s11 = sshll.u32 %s379_s0, 4  ;;  %s380_s12 = smov 64   ;;  %s53_s11 = int_to_ptr.vmem [resolvable:$true] %s52_s11 }
   0xb   :  { %s381_s13 = smov 4  }
   0xc   :  { %58 = dma.hbm_to_vmem [thread:$0]  %s51_s1, 256, %s53_s11, [#allocation6], %s380_s12, %s380_s12, %s381_s13  }
   0xd   :  { %367 = dma.done.wait [#allocation3], 256  }
   0xe   :  { %368 = vsyncadd [#allocation3], 4294967040 }
   0xf   :  { %369 = dma.done.wait [#allocation6], 512  }
  0x10   :  { %370 = vsyncadd [#allocation6], 4294966784  ;;  %v72_v0 = vld [vmem:[#allocation2] sm:$0xff]  ;;  %v74_v1 = vld [vmem:[#allocation5] sm:$0xff]  ;;  %vm78_vm0 = vcmask 261120   ;;  %v382_v8 = vmov 32.0  }
  0x11   :  { %v73_v2 = vld [vmem:[#allocation2 + $0x8] sm:$0xff]  ;;  %v76_v3 = vadd.f32 %v74_v1, %v72_v0  ;;  %v75_v4 = vld [vmem:[#allocation5 + $0x8] sm:$0xff]  ;;  %241 = vrcp.f32 %v382_v8  ;;  %v227_v27 = vld [vmem:[#allocation7] sm:$0xff]  ;;  %s383_s17 = smov [#allocation9]   ;;  %s199_s20 = sshll.u32 %s466_s6, 4  ;;  %s200_s20 = int_to_ptr.hbm [resolvable:$true] %s199_s20 }
  0x12   :  { %v77_v5 = vadd.f32 %v75_v4, %v73_v2  ;;  %v228_v25 = vld [vmem:[#allocation7 + $0x8] sm:$0xff]  ;;  %v239_v46 = vld [vmem:[%s462_s2] ss:$0 sm:$0xff]  ;;  %s197_s18 = sshll.u32 %s383_s17, 4  ;;  %s186_s24 = sshll.u32 %s465_s5, 4  ;;  %s198_s18 = int_to_ptr.vmem [resolvable:$true] %s197_s18  ;;  %s187_s24 = int_to_ptr.hbm [resolvable:$true] %s186_s24 }
  0x13   :  { %v81_v6 = vsel %vm78_vm0, %v76_v3, 0.0  ;;  %79 = vst.msk [vmem:[#allocation9] sm:$0xff] %vm78_vm0, %v76_v3  ;;  %170 = vmatpush.bf16.msra.mxu0 %v228_v25  ;;  %v240_v51 = vld [vmem:[%s463_s3] ss:$0 sm:$0xff]  ;;  %s384_s3 = smov [#allocation8]  }
  0x14   :  { %82 = vadd.xlane.f32.xlu0 %v81_v6  ;;  %80 = vst.msk [vmem:[#allocation9 + $0x8] sm:$0xff] %vm78_vm0, %v77_v5  ;;  %v84_v7 = vsel %vm78_vm0, %v77_v5, 0.0  ;;  %s184_s21 = sshll.u32 %s384_s3, 4  ;;  %s185_s21 = int_to_ptr.vmem [resolvable:$true] %s184_s21 }
  0x15   :  { %205 = dma.vmem_to_hbm [thread:$0]  %s198_s18, 256, %s200_s20, [#allocation10], %s376_s29, %s376_s29, %s377_s30  }
  0x17   :  { %v242_v9 = vpop.eup %241  ;;  %171 = vmatpush.bf16.msra.mxu0 %v227_v27 }
  0x18   :  { %v88_v10 = vmul.f32 32.0, %v242_v9  ;;  %vm92_vm1 = vweird.f32 %v242_v9 }
  0x1a   :  { %v89_v11 = vsub.f32 1.0, %v88_v10 }
  0x1c   :  { %85 = vadd.xlane.f32.xlu0 %v84_v7  ;;  %v90_v12 = vmul.f32 %v242_v9, %v89_v11 }
  0x1e   :  { %v91_v13 = vadd.f32 %v242_v9, %v90_v12 }
  0x20   :  { %v93_v14 = vsel %vm92_vm1, %v242_v9, %v91_v13 }
  0x87   :  { %v83_v15 = vpop.xlane.xlu0 %82 }
  0x88   :  { %v94_v16 = vmul.f32 %v93_v14, %v83_v15 }
  0x8a   :  { %v96_v17 = vsub.f32 %v76_v3, %v94_v16 }
  0x8c   :  { %v98_v18 = vmul.f32 %v96_v17, %v96_v17 }
  0x8e   :  { %v100_v19 = vsel %vm78_vm0, %v98_v18, 0.0 }
  0x8f   :  { %101 = vadd.xlane.f32.xlu1 %v100_v19  ;;  %v86_v20 = vpop.xlane.xlu0 %85 }
  0x90   :  { %v95_v21 = vmul.f32 %v93_v14, %v86_v20 }
  0x92   :  { %v97_v22 = vsub.f32 %v77_v5, %v95_v21 }
  0x94   :  { %v99_v23 = vmul.f32 %v97_v22, %v97_v22 }
  0x96   :  { %v103_v24 = vsel %vm78_vm0, %v99_v23, 0.0 }
  0x97   :  { %104 = vadd.xlane.f32.xlu1 %v103_v24 }
 0x102   :  { %v102_v26 = vpop.xlane.xlu1 %101 }
 0x103   :  { %v106_v28 = vmul.f32 %v102_v26, %v93_v14 }
 0x105   :  { %v108_v29 = vadd.f32 1e-05, %v106_v28 }
 0x107   :  { %243 = vrsqrt.f32 %v108_v29  ;;  %vm116_vm3 = vweird.f32 %v108_v29 }
 0x10a   :  { %v105_v30 = vpop.xlane.xlu1 %104 }
 0x10b   :  { %v107_v31 = vmul.f32 %v105_v30, %v93_v14 }
 0x10d   :  { %v244_v32 = vpop.eup %243  ;;  %v109_v33 = vadd.f32 1e-05, %v107_v31 }
 0x10e   :  { %v111_v34 = vmul.f32 %v244_v32, %v108_v29  ;;  %vm117_vm2 = vweird.f32 %v244_v32 }
 0x10f   :  { %245 = vrsqrt.f32 %v109_v33  ;;  %vm118_vm4 = vmor %vm116_vm3, %vm117_vm2  ;;  %vm126_vm6 = vweird.f32 %v109_v33 }
 0x110   :  { %v112_v35 = vmul.f32 %v244_v32, %v111_v34 }
 0x112   :  { %v113_v36 = vmul.f32 0.5, %v112_v35 }
 0x114   :  { %v114_v37 = vsub.f32 1.5, %v113_v36 }
 0x115   :  { %v246_v38 = vpop.eup %245 }
 0x116   :  { %v115_v39 = vmul.f32 %v244_v32, %v114_v37  ;;  %v121_v40 = vmul.f32 %v246_v38, %v109_v33  ;;  %vm127_vm5 = vweird.f32 %v246_v38 }
 0x117   :  { %vm128_vm7 = vmor %vm126_vm6, %vm127_vm5 }
 0x118   :  { %v122_v41 = vmul.f32 %v246_v38, %v121_v40  ;;  %v119_v42 = vsel %vm118_vm4, %v244_v32, %v115_v39 }
 0x119   :  { %v130_v45 = vmul.f32 %v119_v42, %v96_v17 }
 0x11a   :  { %v123_v43 = vmul.f32 0.5, %v122_v41 }
 0x11b   :  { %v136_v50 = vmul.f32 %v239_v46, %v130_v45 }
 0x11c   :  { %v124_v44 = vsub.f32 1.5, %v123_v43 }
 0x11d   :  { %v142_v53 = vadd.f32 %v240_v51, %v136_v50 }
 0x11e   :  { %v125_v47 = vmul.f32 %v246_v38, %v124_v44 }
 0x120   :  { %v129_v48 = vsel %vm128_vm7, %v246_v38, %v125_v47 }
 0x121   :  { %v131_v49 = vmul.f32 %v129_v48, %v97_v22 }
 0x123   :  { %v137_v52 = vmul.f32 %v239_v46, %v131_v49 }
 0x125   :  { %v143_v54 = vadd.f32 %v240_v51, %v137_v52 }
 0x127   :  { %v144_v55 = vpack.c.bf16 %v143_v54, %v142_v53 }
 0x129   :  { %226 = vmatmul.msk.bf16.vlgmr.msra.gmra.mxu0 %vm78_vm0, %v144_v55 }
 0x1a6   :  { %v173_v56 = vpop.f32.mrf.mxu0 }
 0x1a7   :  { %178 = vst [vmem:[#allocation8] sm:$0xff] %v173_v56 }
 0x1ae   :  { %v175_v57 = vpop.f32.mrf.mxu0 }
 0x1af   :  { %179 = vst [vmem:[#allocation8 + $0x8] sm:$0xff] %v175_v57 }
 0x1b0   :  { %192 = dma.vmem_to_hbm [thread:$0]  %s185_s21, 256, %s187_s24, [#allocation4], %s376_s29, %s376_s29, %s377_s30  }
 0x1b1   :  { %371 = dma.done.wait [#allocation4], 256  }
 0x1b2   :  { %372 = vsyncadd [#allocation4], 4294967040 }
 0x1b3   :  { %373 = dma.done.wait [#allocation10], 256  }
 0x1b4   :  { %374 = vsyncadd [#allocation10], 4294967040 }
 0x1b5   :  { %214 = vsyncpa [#allocation3], 1 }
 0x1b6   :  { %215 = vsyncpa [#allocation6], 1 }
 0x1b7   :  { %216 = vsyncpa [#allocation4], 1 }
 0x1b8   :  { %217 = vsyncpa [#allocation10], 1 }

</bundles_post_ra>
